<compile_context>
chip_gen: v6e
topology: v6e:2x2x1
jax: 0.10.0
libtpu: 0.0.40
codegen_flags: <defaults>
</compile_context>

<pallas_src>
import functools

import jax
import jax.numpy as jnp
from jax.experimental import pallas as pl
from jax.experimental.pallas import tpu as pltpu

HIDDEN = 128            # hidden width of each head (nn.Linear(state_dim, 128))
FUSED_HIDDEN = 2 * HIDDEN


def _round_up(n, m):
    return ((n + m - 1) // m) * m


def ppo_kernel(x_ref, w1_ref, b1_ref, w2_ref, b2_ref, out_ref, *, action_dim):
    # ---- fused layer 1: one matmul covers actor + critic hidden layers ----
    x = x_ref[...]
    if x.dtype != jnp.bfloat16:
        x = x.astype(jnp.bfloat16)
    h = jnp.dot(x, w1_ref[...], preferred_element_type=jnp.float32)
    h = jnp.maximum(h + b1_ref[...], 0.0)                    # (TB, 256) fp32

    # ---- fused layer 2: block-diag weights -> [logits | value | 0 pad] ----
    z = jnp.dot(h.astype(jnp.bfloat16), w2_ref[...],
                preferred_element_type=jnp.float32)
    z = z + b2_ref[...]                                      # (TB, OUT) fp32

    # softmax over the first `action_dim` lanes; (1, OUT) lane row broadcasts.
    out_w = out_ref.shape[-1]
    lane = jax.lax.broadcasted_iota(jnp.int32, (1, out_w), dimension=1)
    logits = jnp.where(lane < action_dim, z, -jnp.inf)
    m = jnp.max(logits, axis=-1, keepdims=True)
    e = jnp.exp(logits - m)                                  # masked lanes -> 0
    denom = jnp.sum(e, axis=-1, keepdims=True)
    probs = e / denom                                        # exact normalize

    # single lane-dense bf16 store: policy in lanes [0, A), value at lane A
    out_ref[...] = jnp.where(lane == action_dim, z, probs).astype(out_ref.dtype)


def pack_params(params):
    """Fuse actor/critic weights once (bf16 matmul inputs, fp32 biases)."""
    action_dim = params["wa2"].shape[1]
    out_pad = _round_up(action_dim + 1, 128)

    w1 = jnp.concatenate([params["wa1"], params["wc1"]], axis=1)    # (S, 256)
    b1 = jnp.concatenate([params["ba1"], params["bc1"]], axis=1)    # (1, 256)

    w2 = jnp.zeros((FUSED_HIDDEN, out_pad), jnp.float32)            # block-diag
    w2 = w2.at[:HIDDEN, :action_dim].set(params["wa2"])
    w2 = w2.at[HIDDEN:, action_dim].set(params["wc2"][:, 0])
    b2 = jnp.zeros((1, out_pad), jnp.float32)
    b2 = b2.at[:, :action_dim].set(params["ba2"])
    b2 = b2.at[:, action_dim].set(params["bc2"][0, 0])

    return dict(w1=w1.astype(jnp.bfloat16), b1=b1.astype(jnp.float32),
                w2=w2.astype(jnp.bfloat16), b2=b2.astype(jnp.float32),
                action_dim=action_dim, out_pad=out_pad)


def ppo_forward(x, params, *, tb=1024, return_slab=False):
    """x: (B, state_dim) fp32 or bf16. Returns (policy (B, A), value (B, 1)),
    or the raw (Bp, 128) bf16 slab if return_slab=True (avoids the extra
    HBM pass that materializes the slices)."""
    B, S = x.shape
    packed = pack_params(params)
    A, OUT = packed["action_dim"], packed["out_pad"]

    # Batch tile: multiple of 8 sublanes, balanced against B to bound padding.
    tb = max(8, _round_up(tb, 8))
    n_tiles = pl.cdiv(B, tb)
    TB = _round_up(pl.cdiv(B, n_tiles), 8)
    Bp = _round_up(B, TB)
    if Bp != B:
        x = jnp.pad(x, ((0, Bp - B), (0, 0)))

    x_item = jnp.dtype(x.dtype).itemsize
    cost = pl.CostEstimate(
        flops=2 * Bp * (S * FUSED_HIDDEN + FUSED_HIDDEN * OUT),
        transcendentals=Bp * OUT,
        bytes_accessed=(Bp * S * x_item
                        + packed["w1"].size * 2 + packed["w2"].size * 2
                        + packed["b1"].size * 4 + packed["b2"].size * 4
                        + Bp * OUT * 2),                      # bf16 output slab
    )

    out = pl.pallas_call(
        functools.partial(ppo_kernel, action_dim=A),
        out_shape=jax.ShapeDtypeStruct((Bp, OUT), jnp.bfloat16),
        grid=(Bp // TB,),
        in_specs=[
            pl.BlockSpec((TB, S), lambda i: (i, 0)),              # x: batch-tiled
            pl.BlockSpec(packed["w1"].shape, lambda i: (0, 0)),   # weights resident
            pl.BlockSpec(packed["b1"].shape, lambda i: (0, 0)),
            pl.BlockSpec(packed["w2"].shape, lambda i: (0, 0)),
            pl.BlockSpec(packed["b2"].shape, lambda i: (0, 0)),
        ],
        out_specs=pl.BlockSpec((TB, OUT), lambda i: (i, 0)),      # lane-dense slab
        compiler_params=pltpu.CompilerParams(
            dimension_semantics=("parallel",)),    # megacore / both v7x TCs
        cost_estimate=cost,
    )(x, packed["w1"], packed["b1"], packed["w2"], packed["b2"])

    if return_slab:
        return out, A

    policy = out[:B, :A]
    value = out[:B, A:A + 1]
    return policy, value


def init_params(key, state_dim, action_dim):
    """Deterministic init mimicking nn.Linear's uniform(-1/sqrt(fan_in), +)."""
    ks = jax.random.split(key, 8)

    def lin(kw, kb, fan_in, fan_out):
        bound = 1.0 / jnp.sqrt(jnp.float32(fan_in))
        w = jax.random.uniform(kw, (fan_in, fan_out), jnp.float32, -bound, bound)
        b = jax.random.uniform(kb, (1, fan_out), jnp.float32, -bound, bound)
        return w, b

    wa1, ba1 = lin(ks[0], ks[1], state_dim, HIDDEN)
    wa2, ba2 = lin(ks[2], ks[3], HIDDEN, action_dim)
    wc1, bc1 = lin(ks[4], ks[5], state_dim, HIDDEN)
    wc2, bc2 = lin(ks[6], ks[7], HIDDEN, 1)
    return dict(wa1=wa1, ba1=ba1, wa2=wa2, ba2=ba2,
                wc1=wc1, bc1=bc1, wc2=wc2, bc2=bc2)


def ppo_reference(x, p):
    """Pure-JAX fp32 reference with the original module semantics."""
    h_a = jnp.maximum(x @ p["wa1"] + p["ba1"], 0.0)
    logits = h_a @ p["wa2"] + p["ba2"]
    policy = jax.nn.softmax(logits, axis=-1)
    h_c = jnp.maximum(x @ p["wc1"] + p["bc1"], 0.0)
    value = h_c @ p["wc2"] + p["bc2"]
    return policy, value


if __name__ == "__main__":
    state_dim, action_dim, batch = 16, 4, 50   # odd batch -> exercises pad path

    key = jax.random.PRNGKey(0)
    k_x, k_p = jax.random.split(key)
    x = jax.random.normal(k_x, (batch, state_dim), jnp.float32)
    params = init_params(k_p, state_dim, action_dim)

    # small tile -> 2-step grid + padded last tile
    policy, value = ppo_forward(x, params, tb=32)
    # default (large) tile -> single grid step
    policy_big, value_big = ppo_forward(x, params)
    jax.block_until_ready((policy, value, policy_big, value_big))

    ref_policy, ref_value = ppo_reference(x, params)
    assert policy.shape == (batch, action_dim)
    assert value.shape == (batch, 1)

    # bf16 matmul inputs + bf16 output slab -> bf16-scale tolerances
    p_err = float(jnp.max(jnp.abs(policy.astype(jnp.float32) - ref_policy)))
    v_err = float(jnp.max(jnp.abs(value.astype(jnp.float32) - ref_value)))
    assert p_err < 2e-2, f"policy max err {p_err}"
    assert v_err < 5e-2, f"value max err {v_err}"

    # both tile configurations must agree exactly
    assert jnp.array_equal(policy, policy_big)
    assert jnp.array_equal(value, value_big)

    # softmax rows sum to 1 (exact normalize in fp32; only bf16 store rounding)
    row_sum = jnp.sum(policy.astype(jnp.float32), axis=-1)
    assert jnp.allclose(row_sum, 1.0, atol=1e-2), f"row sums {row_sum}"

    print("KERNEL_OK")
</pallas_src>

<mosaic_0001>
module attributes {stable_mosaic.version = 11 : i64} {
  func.func @ppo_kernel(%arg0: i32, %arg1: memref<32x16xf32, #tpu.memory_space<vmem>>, %arg2: memref<16x256xbf16, #tpu.memory_space<vmem>>, %arg3: memref<1x256xf32, #tpu.memory_space<vmem>>, %arg4: memref<256x128xbf16, #tpu.memory_space<vmem>>, %arg5: memref<1x128xf32, #tpu.memory_space<vmem>>, %arg6: memref<32x128xbf16, #tpu.memory_space<vmem>>) attributes {dimension_semantics = [#tpu.dimension_semantics<parallel>], iteration_bounds = array<i64: 2>, scalar_prefetch = 0 : i64, scratch_operands = 0 : i64, tpu.core_type = #tpu.core_type<tc>, window_params = [{transform_indices = @transform_0, window_bounds = array<i64: 32, 16>}, {pipeline_mode = #tpu.pipeline_mode<synchronous>, transform_indices = @transform_1, window_bounds = array<i64: 16, 256>}, {pipeline_mode = #tpu.pipeline_mode<synchronous>, transform_indices = @transform_2, window_bounds = array<i64: 1, 256>}, {pipeline_mode = #tpu.pipeline_mode<synchronous>, transform_indices = @transform_3, window_bounds = array<i64: 256, 128>}, {pipeline_mode = #tpu.pipeline_mode<synchronous>, transform_indices = @transform_4, window_bounds = array<i64: 1, 128>}, {transform_indices = @transform_5, window_bounds = array<i64: 32, 128>}]} {
    %c0 = arith.constant 0 : index
    %c0_0 = arith.constant 0 : index
    %0 = vector.load %arg1[%c0, %c0_0] : memref<32x16xf32, #tpu.memory_space<vmem>>, vector<32x16xf32>
    %1 = arith.truncf %0 : vector<32x16xf32> to vector<32x16xbf16>
    %c0_1 = arith.constant 0 : index
    %c0_2 = arith.constant 0 : index
    %2 = vector.load %arg2[%c0_1, %c0_2] : memref<16x256xbf16, #tpu.memory_space<vmem>>, vector<16x256xbf16>
    %cst = arith.constant dense<0.000000e+00> : vector<32x256xf32>
    %3 = tpu.matmul %1, %2, %cst {dimension_numbers = #tpu.dot_dimension_numbers<[1], [0], [0], [1], [0, 0, 1, 1], [], []>} : vector<32x16xbf16>, vector<16x256xbf16>, vector<32x256xf32> -> vector<32x256xf32>
    %c0_3 = arith.constant 0 : index
    %c0_4 = arith.constant 0 : index
    %4 = vector.load %arg3[%c0_3, %c0_4] : memref<1x256xf32, #tpu.memory_space<vmem>>, vector<1x256xf32>
    %5 = vector.broadcast %4 : vector<1x256xf32> to vector<32x256xf32>
    %6 = arith.addf %3, %5 : vector<32x256xf32>
    %cst_5 = arith.constant 0.000000e+00 : f32
    %7 = vector.broadcast %cst_5 : f32 to vector<32x256xf32>
    %8 = arith.maximumf %6, %7 : vector<32x256xf32>
    %9 = arith.truncf %8 : vector<32x256xf32> to vector<32x256xbf16>
    %c0_6 = arith.constant 0 : index
    %c0_7 = arith.constant 0 : index
    %10 = vector.load %arg4[%c0_6, %c0_7] : memref<256x128xbf16, #tpu.memory_space<vmem>>, vector<256x128xbf16>
    %cst_8 = arith.constant dense<0.000000e+00> : vector<32x128xf32>
    %11 = tpu.matmul %9, %10, %cst_8 {dimension_numbers = #tpu.dot_dimension_numbers<[1], [0], [0], [1], [0, 0, 1, 1], [], []>} : vector<32x256xbf16>, vector<256x128xbf16>, vector<32x128xf32> -> vector<32x128xf32>
    %c0_9 = arith.constant 0 : index
    %c0_10 = arith.constant 0 : index
    %12 = vector.load %arg5[%c0_9, %c0_10] : memref<1x128xf32, #tpu.memory_space<vmem>>, vector<1x128xf32>
    %13 = vector.broadcast %12 : vector<1x128xf32> to vector<32x128xf32>
    %14 = arith.addf %11, %13 : vector<32x128xf32>
    %15 = tpu.iota {dimensions = array<i32: 1>} : vector<1x128xi32>
    %c4_i32 = arith.constant 4 : i32
    %16 = vector.broadcast %c4_i32 : i32 to vector<1x128xi32>
    %17 = arith.cmpi slt, %15, %16 : vector<1x128xi32>
    %cst_11 = arith.constant 0xFF800000 : f32
    %18 = vector.shape_cast %17 : vector<1x128xi1> to vector<1x128xi1>
    %19 = vector.broadcast %18 : vector<1x128xi1> to vector<32x128xi1>
    %20 = vector.broadcast %cst_11 : f32 to vector<32x128xf32>
    %21 = arith.select %19, %14, %20 : vector<32x128xi1>, vector<32x128xf32>
    %cst_12 = arith.constant dense<0xFF800000> : vector<32xf32>
    %22 = vector.multi_reduction <maximumf>, %21, %cst_12 [1] : vector<32x128xf32> to vector<32xf32>
    %23 = vector.shape_cast %22 : vector<32xf32> to vector<32x1xf32>
    %24 = vector.broadcast %23 : vector<32x1xf32> to vector<32x128xf32>
    %25 = arith.subf %21, %24 : vector<32x128xf32>
    %26 = math.exp %25 : vector<32x128xf32>
    %cst_13 = arith.constant dense<0.000000e+00> : vector<32xf32>
    %27 = vector.multi_reduction <add>, %26, %cst_13 [1] : vector<32x128xf32> to vector<32xf32>
    %28 = vector.shape_cast %27 : vector<32xf32> to vector<32x1xf32>
    %29 = vector.broadcast %28 : vector<32x1xf32> to vector<32x128xf32>
    %30 = arith.divf %26, %29 : vector<32x128xf32>
    %c4_i32_14 = arith.constant 4 : i32
    %31 = vector.broadcast %c4_i32_14 : i32 to vector<1x128xi32>
    %32 = arith.cmpi eq, %15, %31 : vector<1x128xi32>
    %33 = vector.shape_cast %32 : vector<1x128xi1> to vector<1x128xi1>
    %34 = vector.broadcast %33 : vector<1x128xi1> to vector<32x128xi1>
    %35 = arith.select %34, %14, %30 : vector<32x128xi1>, vector<32x128xf32>
    %36 = arith.truncf %35 : vector<32x128xf32> to vector<32x128xbf16>
    %c0_15 = arith.constant 0 : index
    %c0_16 = arith.constant 0 : index
    %37 = vector.load %arg6[%c0_15, %c0_16] : memref<32x128xbf16, #tpu.memory_space<vmem>>, vector<32x128xbf16>
    tpu.vector_store %arg6[%c0_15, %c0_16], %36 {strides = array<i32>} : memref<32x128xbf16, #tpu.memory_space<vmem>>, vector<32x128xbf16>,
    return
  }
  func.func @transform_0(%arg0: i32) -> (i32, i32) {
    %c0_i32 = arith.constant 0 : i32
    %c0_i32_0 = arith.constant 0 : i32
    return %arg0, %c0_i32 : i32, i32
  }
  func.func @transform_1(%arg0: i32) -> (i32, i32) {
    %c0_i32 = arith.constant 0 : i32
    %c0_i32_0 = arith.constant 0 : i32
    %c0_i32_1 = arith.constant 0 : i32
    return %c0_i32, %c0_i32_0 : i32, i32
  }
  func.func @transform_2(%arg0: i32) -> (i32, i32) {
    %c0_i32 = arith.constant 0 : i32
    %c0_i32_0 = arith.constant 0 : i32
    %c0_i32_1 = arith.constant 0 : i32
    return %c0_i32, %c0_i32_0 : i32, i32
  }
  func.func @transform_3(%arg0: i32) -> (i32, i32) {
    %c0_i32 = arith.constant 0 : i32
    %c0_i32_0 = arith.constant 0 : i32
    %c0_i32_1 = arith.constant 0 : i32
    return %c0_i32, %c0_i32_0 : i32, i32
  }
  func.func @transform_4(%arg0: i32) -> (i32, i32) {
    %c0_i32 = arith.constant 0 : i32
    %c0_i32_0 = arith.constant 0 : i32
    %c0_i32_1 = arith.constant 0 : i32
    return %c0_i32, %c0_i32_0 : i32, i32
  }
  func.func @transform_5(%arg0: i32) -> (i32, i32) {
    %c0_i32 = arith.constant 0 : i32
    %c0_i32_0 = arith.constant 0 : i32
    return %arg0, %c0_i32 : i32, i32
  }
}

</mosaic_0001>

<bundles_post_ra>
// kernel: tpu_custom_call.1
= control target key start
LH: loop header
LB: loop body
LE: loop exit
PB: predicated region body
PF: predicated region fallthrough
CT: control target
= control target key end

     0   :  { %10 = vsyncpa [#allocation3], 0  ;;  %s1151_s0 = inlined_call_operand.vmem [shape: f32[64,16], index: 0, kind: input, shape index: {}]   ;;  %s1152_s1 = inlined_call_operand.vmem [shape: bf16[16,256], index: 1, kind: input, shape index: {}]   ;;  %s1153_s2 = inlined_call_operand.vmem [shape: f32[1,256], index: 2, kind: input, shape index: {}]   ;;  %s1154_s3 = inlined_call_operand.hbm [shape: bf16[256,128], index: 3, kind: input, shape index: {}]   ;;  %s1155_s4 = inlined_call_operand.vmem [shape: f32[1,128], index: 4, kind: input, shape index: {}]   ;;  %s1156_s5 = inlined_call_operand.hbm [shape: bf16[64,128], index: 5, kind: output, shape index: {}]  }
   0x1   :  { %11 = vsyncpa [#allocation4], 0 }
   0x2   :  { %13 = vsyncpa [#allocation4 + $0x1], 0  ;;  %s1006_s18 = smov 0   ;;  %s1008_s19 = smov 0  }
   0x3   :  { %s1010_s20 = smov 0   ;;  %s1012_s21 = smov 0  }
   0x4 LB: > { %s1027_s22 = sadd.s32 4294967295, %s967_s21   ;;  %s688_s23 = sadd.s32 4294967294, %s967_s21   ;;  %s967_s21 = sphi %s1012_s21, %s1164_s21   ;;  %s963_s20 = sphi %s1010_s20, %s1163_s20   ;;  %s959_s19 = sphi %s1008_s19, %s1162_s19   ;;  %s955_s18 = sphi %s1006_s18, %s1161_s18  }
   0x5   : > { %s1031_s24 = sadd.s32 1, %s967_s21   ;;  %s136_s25 = sadd.s32 1, %s963_s20 }
   0x6   : > { %s133_s26 = ssub.s32 %s967_s21, %s1031_s24  ;;  %p146_p0 = scmp.ne.s32.totalorder %s963_s20, %s959_s19 }
   0x7   : > { %p134_p1 = scmp.eq.s32.totalorder %s133_s26, 0  ;;  %p147_p2 = scmp.eq.s32.totalorder %s1027_s22, 1 }
   0x8   : > { %p152_p3 = scmp.ne.s32.totalorder %s959_s19, %s955_s18  ;;  %p153_p4 = scmp.eq.s32.totalorder %s688_s23, 1 }
   0x9   : > { %s1042_s27 = scalar_select %p134_p1, %s963_s20, %s136_s25  }
   0xa   : > { %p1044_p5 = por %p147_p2, %p146_p0  ;;  %p1048_p6 = por %p153_p4, %p152_p3 }
   0xb   : > { %p689_p7 = scmp.ge.s32.totalorder %s967_s21, 1  ;;  %p160_p8 = scmp.lt.s32.totalorder %s967_s21, 3 }
   0xc   : > { %s1158_s29 = scalar_select %p1048_p6, 1, 0 }
   0xd   : > { %p801_p9 = scmp.eq.s32.totalorder %s1027_s22, 0  ;;  %p1055_p10 = pnand %p689_p7, %p160_p8 }
   0xe   : > { %s969_s6 = smov [#allocation2]  }
   0xf   : > { %s178_s7 = sshll.u32 %s969_s6, 4  ;;  %p793_p11 = pneg %p1055_p10  ;;  %s179_s7 = int_to_ptr.vmem [resolvable:$true] %s178_s7 }
  0x10   : > { %s888_s8 = scalar_lea.vmem %s179_s7, 2048  ;;  %p896_p3 = scmp.lt.s32.totalorder %s179_s7, %s179_s7 }
  0x11   : > { %p794_p12 = pnand %p801_p9, %p793_p11  ;;  %p889_p0 = scmp.ne.s32.totalorder %s179_s7, %s888_s8 }
  0x12   : > { %p897_p4 = scmp.lt.s32.totalorder %s888_s8, %s888_s8 }
  0x13   : > { %p879_p13 = pneg %p794_p12 }
  0x14   : > { %p898_p6 = por %p897_p4, %p896_p3 }
  0x15   : > { %p891_p1 = pnand %p889_p0, %p879_p13 }
  0x17   : > { %p892_p2 = pneg %p891_p1 }
  0x19   : > { %p899_p7 = pnand %p898_p6, %p892_p2 }
  0x1b   : > { %902 = shalt.err (!%p899_p7)
}
  0x1c   : > { %s970_s9 = smov 64   ;;  %s971_s10 = smov 4  }
  0x1d   : > { %796 = dma.hbm_to_vmem [thread:$0]  (!%p794_p12), %s1154_s3, 2048, %s179_s7, [#allocation3], %s970_s9, %s970_s9, %s971_s10  }
  0x1e   : > { %206 = sbr.rel (%p1055_p10) target bundleno = 790 (0x316), region = 40 }
  0x23   : > { %946 = dma.done.wait (%p801_p9), [#allocation3], 2048  }
  0x24   : > { %948 = vsyncadd (%p801_p9), [#allocation3], 4294965248  ;;  %s695_s13 = sshll.u32 %s1027_s22, 2  ;;  %v972_v0 = vmov 0   ;;  %v842_v1 = vld [vmem:[%s1152_s1 + $0x4] ss:$8 sps:$4 sm:$0xff]   ;;  %v252_v25 = vlaneseq }
  0x25   : > { %311 = vmatprep.mubr.bf16.mxu0 %v972_v0  ;;  %p235_p6 = scmp.lt.s32.totalorder %s695_s13, 7  ;;  %v844_v2 = vld [vmem:[%s1152_s1] ss:$8 sps:$4 sm:$0xff]   ;;  %293 = vmatprep.subr.bf16.mxu0 %v842_v1  ;;  %vm272_vm0 = vcmask 130048   ;;  %v845_v6 = vld [vmem:[#allocation2 + $0x78] sm:$0xff]   ;;  %v847_v9 = vld [vmem:[#allocation2 + $0x70] sm:$0xff]  }
  0x26   : > { %294 = vmatpush1.bf16.msra.mxu0 %v844_v2  ;;  %v846_v7 = vld [vmem:[#allocation2 + $0x38] sm:$0xff]   ;;  %771 = vmatprep.subr.bf16.mxu1 %v845_v6  ;;  %v848_v11 = vld [vmem:[#allocation2 + $0x30] sm:$0xff]   ;;  %v849_v12 = vld [vmem:[#allocation2 + $0x68] sm:$0xff]   ;;  %v253_v26 = vshrl.u32 %v252_v25, 7  ;;  %v1087_v61 = vand.u32 127, %v252_v25  ;;  %s231_s10 = sand.u32 1, %s959_s19  }
  0x27   : > { %s1166_s13 = smov (!%p235_p6, %s695_s13), 7  ;;  %743 = vmatprep.subr.bf16.mxu0 %v845_v6  ;;  %779 = vmatpush3.bf16.msra.mxu1 %v846_v7  ;;  %v850_v14 = vld [vmem:[#allocation2 + $0x28] sm:$0xff]   ;;  %v851_v15 = vld [vmem:[#allocation2 + $0x60] sm:$0xff]   ;;  %v853_v17 = vld [vmem:[#allocation2 + $0x58] sm:$0xff]   ;;  %s694_s11 = sshll.u32 %s231_s10, 4 }
  0x28   : > { %s696_s14 = sshll.u32 %s1166_s13, 3  ;;  %772 = vmatprep.subr.bf16.mxu1 %v847_v9  ;;  %v852_v16 = vld [vmem:[#allocation2 + $0x20] sm:$0xff]   ;;  %v854_v18 = vld [vmem:[#allocation2 + $0x18] sm:$0xff]   ;;  %v855_v19 = vld [vmem:[#allocation2 + $0x50] sm:$0xff]   ;;  %v258_v27 = vsub.s32 1, %v253_v26  ;;  %v254_v28 = vsub.s32 0, %v253_v26 }
  0x29   : > { %s238_s17 = scalar_lea.vmem %s1151_s0, %s696_s14  ;;  %v856_v20 = vld [vmem:[#allocation2 + $0x10] sm:$0xff]   ;;  %v857_v21 = vld [vmem:[#allocation2 + $0x48] sm:$0xff]   ;;  %v859_v23 = vld [vmem:[#allocation2 + $0x40] sm:$0xff]   ;;  %vm530_vm1 = vcmp.lt.s32.totalorder %v1087_v61, 4  ;;  %vm573_vm2 = vcmp.eq.s32.totalorder %v1087_v61, 4  ;;  %s233_s12 = scalar_lea.vmem [#allocation5], %s694_s11 }
  0x2a   : > { %v242_v3 = vld [vmem:[%s238_s17] sm:$0xff]  ;;  %v243_v4 = vld [vmem:[%s238_s17 + $0x8] sm:$0xff]  ;;  %v244_v8 = vld [vmem:[%s238_s17 + $0x10] sm:$0xff]  ;;  %s731_s13 = sshll.u32 %s1027_s22, 8  ;;  %s614_s14 = sshll.u32 %s233_s12, 4  ;;  %s1109_s14 = int_to_ptr.vmem [resolvable:$true] %s614_s14 }
  0x2b   : > { %v246_v5 = vpack.c.bf16 %v243_v4, %v242_v3  ;;  %v245_v10 = vld [vmem:[%s238_s17 + $0x18] sm:$0xff]  ;;  %780 = vmatpush3.bf16.msra.mxu1 %v848_v11  ;;  %v858_v22 = vld [vmem:[#allocation2 + $0x8] sm:$0xff]   ;;  %v860_v24 = vld [vmem:[#allocation2] sm:$0xff]   ;;  %s1107_s17 = scalar_lea.hbm %s1156_s5, %s731_s13  ;;  %s1111_s23 = scalar_lea.sflag [#allocation4], %s231_s10 }
  0x2c   : > { %v247_v13 = vpack.c.bf16 %v245_v10, %v244_v8  ;;  %773 = vmatprep.subr.bf16.mxu1 %v849_v12  ;;  %v250_v29 = vld [vmem:[%s1153_s2] sm:$0x3]  ;;  %s903_s25 = scalar_lea.vmem %s1109_s14, 256  ;;  %s973_s22 = smov [#allocation5]  }
  0x2d   : > { %699 = vmatmul.mubr.msk.bf16.vlgmr.msra.gmra.mxu0 %vm272_vm0, %v246_v5  ;;  %v259_v31 = vrot.slane %v250_v29, %v258_v27  ;;  %v255_v32 = vrot.slane %v250_v29, %v254_v28  ;;  %v701_v63 = vld [vmem:[%s1155_s4] ss:$0 sm:$0xff]  ;;  %p904_p8 = scmp.ne.s32.totalorder %s1109_s14, %s903_s25  ;;  %s907_s26 = sshll.u32 %s973_s22, 4  ;;  %s908_s26 = int_to_ptr.vmem [resolvable:$false] %s907_s26 }
  0x2e   : > { %321 = vmatprep.mubr.bf16.mxu0 %v972_v0  ;;  %744 = vmatpush3.bf16.msra.mxu0 %v846_v7  ;;  %s909_s30 = scalar_lea.vmem %s908_s26, 512  ;;  %p910_p11 = scmp.lt.s32.totalorder %s1109_s14, %s908_s26 }
  0x2f   : > { %745 = vmatprep.subr.bf16.mxu0 %v847_v9  ;;  %781 = vmatpush3.bf16.msra.mxu1 %v850_v14  ;;  %p905_p9 = pnand %p904_p8, %p1044_p5  ;;  %p911_p12 = scmp.lt.s32.totalorder %s909_s30, %s903_s25 }
  0x30   : > { %774 = vmatprep.subr.bf16.mxu1 %v851_v15 }
  0x31   : > { %p906_p10 = pneg %p905_p9  ;;  %p912_p13 = por %p911_p12, %p910_p11 }
  0x32   : > { %746 = vmatpush3.bf16.msra.mxu0 %v848_v11 }
  0x33   : > { %747 = vmatprep.subr.bf16.mxu0 %v849_v12  ;;  %782 = vmatpush3.bf16.msra.mxu1 %v852_v16  ;;  %p913_p0 = pnand %p912_p13, %p906_p10 }
  0x34   : > { %775 = vmatprep.subr.bf16.mxu1 %v853_v17 }
  0x35   : > { %700 = vmatmul.mubr.msk.bf16.gmra.mxu0 %vm272_vm0, %v247_v13 }
  0x36   : > { %748 = vmatpush3.bf16.msra.mxu0 %v850_v14 }
  0x37   : > { %749 = vmatprep.subr.bf16.mxu0 %v851_v15  ;;  %783 = vmatpush3.bf16.msra.mxu1 %v854_v18 }
  0x38   : > { %776 = vmatprep.subr.bf16.mxu1 %v855_v19 }
  0x3a   : > { %750 = vmatpush3.bf16.msra.mxu0 %v852_v16 }
  0x3b   : > { %751 = vmatprep.subr.bf16.mxu0 %v853_v17  ;;  %784 = vmatpush3.bf16.msra.mxu1 %v856_v20 }
  0x3c   : > { %777 = vmatprep.subr.bf16.mxu1 %v857_v21 }
  0x3e   : > { %752 = vmatpush3.bf16.msra.mxu0 %v854_v18 }
  0x3f   : > { %753 = vmatprep.subr.bf16.mxu0 %v855_v19  ;;  %785 = vmatpush3.bf16.msra.mxu1 %v858_v22 }
  0x40   : > { %778 = vmatprep.subr.bf16.mxu1 %v859_v23 }
  0x42   : > { %754 = vmatpush3.bf16.msra.mxu0 %v856_v20 }
  0x43   : > { %755 = vmatprep.subr.bf16.mxu0 %v857_v21  ;;  %786 = vmatpush3.bf16.msra.mxu1 %v860_v24 }
  0x46   : > { %756 = vmatpush3.bf16.msra.mxu0 %v858_v22 }
  0x47   : > { %757 = vmatprep.subr.bf16.mxu0 %v859_v23 }
  0x4a   : > { %758 = vmatpush3.bf16.msra.mxu0 %v860_v24 }
  0xed   : > { %v313_v30 = vpop.f32.mrf.mxu0 }
  0xee   : > { %v314_v37 = vadd.f32 %v313_v30, %v255_v32 }
  0xef   : > { %v315_v33 = vpop.f32.mrf.mxu0 }
  0xf0   : > { %v316_v35 = vadd.f32 %v315_v33, %v259_v31  ;;  %v332_v44 = vmax.f32 %v314_v37, 0.0 }
  0xf1   : > { %v317_v34 = vpop.f32.mrf.mxu0 }
  0xf2   : > { %v318_v36 = vadd.f32 %v317_v34, %v255_v32  ;;  %v333_v42 = vmax.f32 %v316_v35, 0.0 }
  0xf3   : > { %v319_v38 = vpop.f32.mrf.mxu0 }
  0xf4   : > { %v320_v39 = vadd.f32 %v319_v38, %v259_v31  ;;  %v334_v40 = vmax.f32 %v318_v36, 0.0 }
  0xf5   : > { %v323_v41 = vpop.f32.mrf.mxu0 }
  0xf6   : > { %v335_v43 = vmax.f32 %v320_v39, 0.0  ;;  %v340_v47 = vpack.c.bf16 %v334_v40, %v332_v44  ;;  %v324_v51 = vadd.f32 %v323_v41, %v255_v32 }
  0xf7   : > { %v325_v45 = vpop.f32.mrf.mxu0 }
  0xf8   : > { %v341_v46 = vpack.c.bf16 %v335_v43, %v333_v42  ;;  %v326_v49 = vadd.f32 %v325_v45, %v259_v31  ;;  %v336_v57 = vmax.f32 %v324_v51, 0.0 }
  0xf9   : > { %v327_v48 = vpop.f32.mrf.mxu0 }
  0xfa   : > { %v328_v50 = vadd.f32 %v327_v48, %v255_v32  ;;  %511 = vmatprep.mubr.bf16.mxu0 %v341_v46  ;;  %v337_v55 = vmax.f32 %v326_v49, 0.0 }
  0xfb   : > { %v329_v52 = vpop.f32.mrf.mxu0  ;;  %512 = vmatmul.mubr.bf16.vlgmr.msra.gmra.mxu0 %v340_v47 }
  0xfc   : > { %v330_v53 = vadd.f32 %v329_v52, %v259_v31  ;;  %v338_v54 = vmax.f32 %v328_v50, 0.0 }
  0xfe   : > { %v339_v56 = vmax.f32 %v330_v53, 0.0  ;;  %v342_v59 = vpack.c.bf16 %v338_v54, %v336_v57 }
 0x100   : > { %v343_v58 = vpack.c.bf16 %v339_v56, %v337_v55 }
 0x102   : > { %519 = vmatprep.mubr.bf16.mxu1 %v343_v58 }
 0x103   : > { %520 = vmatmul.mubr.bf16.vlgmr.msra.gmra.mxu1 %v342_v59 }
 0x1bb   : > { %v759_v60 = vpop.f32.mrf.mxu0 }
 0x1bd   : > { %v760_v62 = vpop.f32.mrf.mxu0 }
 0x1be   : > { %v761_v0 = vadd.f32 %v760_v62, %v759_v60 }
 0x1bf   : > { %v762_v1 = vpop.f32.mrf.mxu0 }
 0x1c0   : > { %v514_v2 = vadd.f32 %v761_v0, %v701_v63 }
 0x1c1   : > { %v763_v3 = vpop.f32.mrf.mxu0 }
 0x1c2   : > { %v764_v4 = vadd.f32 %v763_v3, %v762_v1  ;;  %v533_v5 = vsel %vm530_vm1, %v514_v2, -inf }
 0x1c3   : > { %v765_v6 = vpop.f32.mrf.mxu1  ;;  %537 = vmax.xlane.f32.xlu0 %v533_v5 }
 0x1c4   : > { %v517_v7 = vadd.f32 %v764_v4, %v701_v63 }
 0x1c5   : > { %v766_v8 = vpop.f32.mrf.mxu1 }
 0x1c6   : > { %v767_v9 = vadd.f32 %v766_v8, %v765_v6  ;;  %v534_v10 = vsel %vm530_vm1, %v517_v7, -inf }
 0x1c7   : > { %v768_v11 = vpop.f32.mrf.mxu1  ;;  %539 = vmax.xlane.f32.xlu0 %v534_v10 }
 0x1c8   : > { %v522_v12 = vadd.f32 %v767_v9, %v701_v63 }
 0x1c9   : > { %v769_v13 = vpop.f32.mrf.mxu1 }
 0x1ca   : > { %v770_v14 = vadd.f32 %v769_v13, %v768_v11  ;;  %v535_v15 = vsel %vm530_vm1, %v522_v12, -inf }
 0x1cb   : > { %541 = vmax.xlane.f32.xlu1 %v535_v15 }
 0x1cc   : > { %v525_v16 = vadd.f32 %v770_v14, %v701_v63 }
 0x1ce   : > { %v536_v17 = vsel %vm530_vm1, %v525_v16, -inf }
 0x1cf   : > { %543 = vmax.xlane.f32.xlu1 %v536_v17 }
 0x24c   : > { %v538_v18 = vpop.xlane.xlu0 %537 }
 0x24d   : > { %v545_v19 = vsub.f32 %v533_v5, %v538_v18 }
 0x24f   : > { %v549_v20 = vmul.f32 1.442695, %v545_v19 }
 0x250   : > { %v540_v21 = vpop.xlane.xlu0 %539 }
 0x251   : > { %861 = vpow2.f32 %v549_v20  ;;  %v546_v22 = vsub.f32 %v534_v10, %v540_v21 }
 0x253   : > { %v551_v23 = vmul.f32 1.442695, %v546_v22 }
 0x254   : > { %v542_v24 = vpop.xlane.xlu1 %541 }
 0x255   : > { %863 = vpow2.f32 %v551_v23  ;;  %v547_v25 = vsub.f32 %v535_v15, %v542_v24 }
 0x257   : > { %v553_v26 = vmul.f32 1.442695, %v547_v25 }
 0x258   : > { %v544_v27 = vpop.xlane.xlu1 %543 }
 0x259   : > { %865 = vpow2.f32 %v553_v26  ;;  %v548_v28 = vsub.f32 %v536_v17, %v544_v27 }
 0x25b   : > { %v555_v29 = vmul.f32 1.442695, %v548_v28 }
 0x25d   : > { %867 = vpow2.f32 %v555_v29 }
 0x25e   : > { %v862_v30 = vpop.eup %861 }
 0x25f   : > { %557 = vadd.xlane.f32.xlu0 %v862_v30 }
 0x262   : > { %v864_v31 = vpop.eup %863 }
 0x263   : > { %559 = vadd.xlane.f32.xlu1 %v864_v31 }
 0x266   : > { %v866_v32 = vpop.eup %865 }
 0x267   : > { %561 = vadd.xlane.f32.xlu0 %v866_v32 }
 0x26a   : > { %v868_v33 = vpop.eup %867 }
 0x26b   : > { %563 = vadd.xlane.f32.xlu1 %v868_v33 }
 0x2e8   : > { %v558_v34 = vpop.xlane.xlu0 %557 }
 0x2e9   : > { %869 = vrcp.f32 %v558_v34 }
 0x2ec   : > { %v560_v35 = vpop.xlane.xlu1 %559 }
 0x2ed   : > { %871 = vrcp.f32 %v560_v35 }
 0x2f0   : > { %v562_v36 = vpop.xlane.xlu0 %561 }
 0x2f1   : > { %873 = vrcp.f32 %v562_v36 }
 0x2f4   : > { %v564_v37 = vpop.xlane.xlu1 %563 }
 0x2f5   : > { %875 = vrcp.f32 %v564_v37 }
 0x2f6   : > { %v870_v38 = vpop.eup %869 }
 0x2f7   : > { %v566_v39 = vmul.f32 %v870_v38, %v862_v30 }
 0x2f9   : > { %v576_v42 = vsel %vm573_vm2, %v514_v2, %v566_v39 }
 0x2fa   : > { %v872_v40 = vpop.eup %871 }
 0x2fb   : > { %v568_v41 = vmul.f32 %v872_v40, %v864_v31 }
 0x2fd   : > { %v577_v43 = vsel %vm573_vm2, %v517_v7, %v568_v41 }
 0x2fe   : > { %v874_v44 = vpop.eup %873  ;;  %v735_v45 = vpack.c.bf16 %v577_v43, %v576_v42 }
 0x2ff   : > { %v570_v46 = vmul.f32 %v874_v44, %v866_v32 }
 0x300   : > { %736 = vst [vmem:[%s233_s12] sm:$0xff] %v735_v45  }
 0x301   : > { %v578_v49 = vsel %vm573_vm2, %v522_v12, %v570_v46 }
 0x302   : > { %v876_v47 = vpop.eup %875 }
 0x303   : > { %v572_v48 = vmul.f32 %v876_v47, %v868_v33 }
 0x305   : > { %v579_v50 = vsel %vm573_vm2, %v525_v16, %v572_v48 }
 0x306   : > { %v740_v51 = vpack.c.bf16 %v579_v50, %v578_v49 }
 0x308   : > { %742 = vst [vmem:[%s233_s12 + $0x8] sm:$0xff] %v740_v51  }
 0x309   : > { %916 = shalt.err (!%p913_p0)
}
 0x30a   : > { %s917_s6 = scalar_lea.hbm %s1107_s17, 256  ;;  %s921_s9 = scalar_lea.hbm %s1156_s5, 512 }
 0x30b   : > { %p918_p1 = scmp.ne.s32.totalorder %s1107_s17, %s917_s6  ;;  %p922_p4 = scmp.lt.s32.totalorder %s1107_s17, %s1156_s5 }
 0x30c   : > { %p923_p7 = scmp.lt.s32.totalorder %s921_s9, %s917_s6 }
 0x30d   : > { %p919_p2 = pnand %p918_p1, %p1044_p5 }
 0x30e   : > { %p924_p6 = por %p923_p7, %p922_p4 }
 0x30f   : > { %p920_p3 = pneg %p919_p2 }
 0x311   : > { %p925_p8 = pnand %p924_p6, %p920_p3 }
 0x313   : > { %928 = shalt.err (!%p925_p8)
}
 0x314   : > { %s974_s12 = smov 64   ;;  %s975_s13 = smov 4  }
 0x315   : > { %791 = dma.vmem_to_hbm [thread:$0]  (%p1044_p5), %s1109_s14, 256, %s1107_s17, %s1111_s23, %s974_s12, %s974_s12, %s975_s13  }
 0x316 PF: > { %p803_p9 = scmp.ge.s32.totalorder %s967_s21, 2  ;;  %s629_s15 = sand.u32 1, %s955_s18  }
 0x317   : > { %p1160_p10 = scmp.ne.s32.totalorder %s1158_s29, 0  ;;  %s630_s16 = scalar_lea.sflag [#allocation4], %s629_s15 }
 0x319   : > { %p798_p11 = pnand %p803_p9, %p1160_p10 }
 0x31b   : > { %p799_p12 = pneg %p798_p11 }
 0x31d   : > { %950 = dma.done.wait (%p799_p12), %s630_s16, 256  }
 0x31e   : > { %952 = vsyncadd (%p799_p12), %s630_s16, 4294967040  ;;  %p16_p13 = scmp.ge.s32.totalorder %s1031_s24, 4   ;;  %s1161_s18 = smov %s959_s19 }
 0x31f   : > { %s1162_s19 = smov %s963_s20  ;;  %s1163_s20 = smov %s1042_s27 }
 0x320   : > { %s1164_s21 = smov %s1031_s24  ;;  %18 = sbr.rel (!%p16_p13) target bundleno = 4 (0x4), region = 80 }
 0x325   :  { %635 = vsyncpa [#allocation3], 1 }
 0x326   :  { %637 = vsyncpa [#allocation3 + $0x1], 1 }
 0x327   :  { %638 = vsyncpa [#allocation4], 1 }
 0x328   :  { %640 = vsyncpa [#allocation4 + $0x1], 1 }

</bundles_post_ra>
